<compile_context>
chip_gen: v5e
topology: v5e:2x2
jax: 0.10.0
libtpu: 0.0.40
codegen_flags: <defaults>
</compile_context>

<pallas_src>
import jax
import jax.numpy as jnp
from jax.experimental import pallas as pl
from jax.experimental.pallas import tpu as pltpu


def _msm_rnn_kernel(x_ref, wih_t_ref, whh_t_ref, b_ref, h0_ref,
                    hall_ref, h_scratch, proj_scratch):
    """One grid step == one chunk of T_chunk time steps of the ReLU RNN.

    Ref shapes:
      x_ref        : (B, T_chunk, D_in)       input chunk (batch-first)
      wih_t_ref    : (D_in, H_total)          W_ih transposed
      whh_t_ref    : (H_total, H_total)       masked W_hh transposed
      b_ref        : (1, H_total)  f32        b_ih + b_hh
      h0_ref       : (B, H_total)  f32        initial hidden state
      hall_ref     : (B, T_chunk, H_total)    output chunk (batch-first)
      h_scratch    : (B, H_total)  f32        recurrent carry across chunks
      proj_scratch : (B, T_chunk, H_total) f32  hoisted input projection
    """
    c = pl.program_id(0)
    B, t_chunk, d_in = x_ref.shape
    H = whh_t_ref.shape[0]
    w_dtype = wih_t_ref.dtype

    @pl.when(c == 0)
    def _():
        h_scratch[...] = h0_ref[...].astype(jnp.float32)

    # ---- Phase 1: hoisted, batched input projection for the whole chunk. ----
    # (B, T_chunk, D_in) -> (B*T_chunk, D_in); layout no-op since T_chunk % 8 == 0.
    x2d = x_ref[...].reshape(B * t_chunk, d_in).astype(w_dtype)
    proj2d = jnp.dot(x2d, wih_t_ref[...], preferred_element_type=jnp.float32)
    proj2d = proj2d + b_ref[...]
    proj_scratch[...] = proj2d.reshape(B, t_chunk, H)

    # ---- Phase 2: serialized recurrence over the chunk (fully unrolled, ----
    # ---- static indices; only h @ W_hh^T + relu per step).               ----
    whh = whh_t_ref[...]
    h = h_scratch[...]                      # f32 carry
    for t in range(t_chunk):                # static unroll (t_chunk <= 64)
        p_t = proj_scratch[:, t, :]         # (B, H) f32
        pre = jnp.dot(h.astype(w_dtype), whh,
                      preferred_element_type=jnp.float32) + p_t
        h = jnp.maximum(pre, 0.0)
        hall_ref[:, t, :] = h.astype(hall_ref.dtype)

    h_scratch[...] = h


def _pick_t_chunk(B, T, D_in, H_total, itemsize, vmem_budget_bytes=8 << 20):
    """Largest multiple-of-8 chunk (<=64) whose working set fits a small budget."""
    t_chunk = min(64, ((T + 7) // 8) * 8)
    while t_chunk > 8:
        # double-buffered x chunk + output chunk, resident weights, scratches.
        per_chunk = (2 * B * t_chunk * D_in * itemsize              # x (2 buffers)
                     + 2 * B * t_chunk * H_total * itemsize          # out (2 buffers)
                     + B * t_chunk * H_total * 4)                    # proj scratch f32
        resident = (D_in * H_total + H_total * H_total) * itemsize + \
                   (H_total + 2 * B * H_total) * 4
        if per_chunk + resident <= vmem_budget_bytes:
            break
        t_chunk -= 8
    return max(8, t_chunk)


def msm_layer_forward(x, w_ih, w_hh_masked, b_ih, b_hh, num_rnn, h_0=None):
    """Pallas implementation of MultiScaleMemoryLayerParallel.forward.

    Args:
      x            : (B, T, D_in)  batch-first input (PyTorch convention)
      w_ih         : (H_total, D_in)
      w_hh_masked  : (H_total, H_total)  already multiplied by the block-diag mask
      b_ih, b_hh   : (H_total,)
      num_rnn      : number of independent sub-RNNs
      h_0          : optional (1, B, H_total) initial hidden state

    Returns:
      hs_all : (B, T, num_rnn, hidden_size)
      hidden : (1, B, H_total)
    """
    B, T, D_in = x.shape
    H_total = w_ih.shape[0]
    hidden_size = H_total // num_rnn
    out_dtype = x.dtype
    itemsize = jnp.dtype(out_dtype).itemsize

    # Time chunking: T_chunk is a multiple of 8 (<= 64), bounded by a VMEM budget.
    t_chunk = _pick_t_chunk(B, T, D_in, H_total, itemsize)
    t_pad = pl.cdiv(T, t_chunk) * t_chunk
    x_in = x if t_pad == T else jnp.pad(x, ((0, 0), (0, t_pad - T), (0, 0)))
    num_chunks = t_pad // t_chunk

    # One-time (tiny) weight preparation; activations stay batch-first end-to-end.
    wih_t = jnp.transpose(w_ih)                          # (D_in, H_total)
    whh_t = jnp.transpose(w_hh_masked)                   # (H_total, H_total)
    bias = (b_ih + b_hh).reshape(1, H_total).astype(jnp.float32)
    if h_0 is None:
        h0 = jnp.zeros((B, H_total), jnp.float32)
    else:
        h0 = h_0.reshape(B, H_total).astype(jnp.float32)

    # Advisory cost estimate: full recurrence FLOPs + HBM traffic.
    flops = 2 * B * t_pad * H_total * (D_in + H_total)
    bytes_accessed = (
        x_in.size * x_in.dtype.itemsize
        + wih_t.size * wih_t.dtype.itemsize
        + whh_t.size * whh_t.dtype.itemsize
        + bias.size * 4 + h0.size * 4
        + B * t_pad * H_total * itemsize
    )

    grid_spec = pltpu.PrefetchScalarGridSpec(
        num_scalar_prefetch=0,
        grid=(num_chunks,),
        in_specs=[
            pl.BlockSpec((B, t_chunk, D_in), lambda c: (0, c, 0)),    # x chunk
            pl.BlockSpec((D_in, H_total), lambda c: (0, 0)),          # W_ih^T (resident)
            pl.BlockSpec((H_total, H_total), lambda c: (0, 0)),       # W_hh^T (resident)
            pl.BlockSpec((1, H_total), lambda c: (0, 0)),             # bias   (resident)
            pl.BlockSpec((B, H_total), lambda c: (0, 0)),             # h0     (resident)
        ],
        out_specs=pl.BlockSpec((B, t_chunk, H_total), lambda c: (0, c, 0)),
        scratch_shapes=[
            pltpu.VMEM((B, H_total), jnp.float32),              # recurrent carry
            pltpu.VMEM((B, t_chunk, H_total), jnp.float32),     # hoisted projection
        ],
    )

    h_all_full = pl.pallas_call(
        _msm_rnn_kernel,
        out_shape=jax.ShapeDtypeStruct((B, t_pad, H_total), out_dtype),
        grid_spec=grid_spec,
        compiler_params=pltpu.CompilerParams(
            dimension_semantics=("arbitrary",),   # sequential recurrence over time
        ),
        cost_estimate=pl.CostEstimate(
            flops=flops, transcendentals=0, bytes_accessed=bytes_accessed),
    )(x_in, wih_t, whh_t, bias, h0)

    # Back to PyTorch output conventions (no big transposes needed).
    h_all = h_all_full[:, :T, :]                                  # (B, T, H_total)
    # torch.chunk(dim=2) + torch.stack(dim=2) == reshape to (B, T, num_rnn, hidden)
    hs_all = h_all.reshape(B, T, num_rnn, hidden_size)
    # Last hidden state of a vanilla RNN == last output row; no per-step store needed.
    hidden = h_all_full[:, T - 1, :].reshape(1, B, H_total)
    return hs_all, hidden


def _reference_forward(x, w_ih, w_hh_masked, b_ih, b_hh, num_rnn, h_0=None):
    """Pure-JAX reference (lax.scan) for correctness checking."""
    B, T, D_in = x.shape
    H_total = w_ih.shape[0]
    h0 = jnp.zeros((B, H_total)) if h_0 is None else h_0.reshape(B, H_total)

    def step(h, x_t):
        h_new = jax.nn.relu(x_t @ w_ih.T + b_ih + h @ w_hh_masked.T + b_hh)
        return h_new, h_new

    x_tm = jnp.transpose(x, (1, 0, 2))
    h_last, h_all_tm = jax.lax.scan(step, h0, x_tm)
    h_all = jnp.transpose(h_all_tm, (1, 0, 2))
    hs_all = h_all.reshape(B, T, num_rnn, H_total // num_rnn)
    return hs_all, h_last.reshape(1, B, H_total)


if __name__ == "__main__":
    # Small, TPU-friendly shapes consistent with the module.
    batch, T = 2, 8
    input_size = 4
    hidden_size = 32
    num_rnn = 4
    H_total = hidden_size * num_rnn  # 128

    key = jax.random.PRNGKey(0)
    k_x, k_wih, k_whh, k_bih, k_bhh = jax.random.split(key, 5)

    # Deterministic parameter init mimicking nn.RNN's default uniform(-1/sqrt(H), 1/sqrt(H)).
    bound = 1.0 / jnp.sqrt(jnp.float32(H_total))
    w_ih = jax.random.uniform(k_wih, (H_total, input_size), jnp.float32, -bound, bound)
    w_hh = jax.random.uniform(k_whh, (H_total, H_total), jnp.float32, -bound, bound)
    b_ih = jax.random.uniform(k_bih, (H_total,), jnp.float32, -bound, bound)
    b_hh = jax.random.uniform(k_bhh, (H_total,), jnp.float32, -bound, bound)

    # Block-diagonal ones mask (mask_init), applied to weight_hh as in forward().
    mask = jnp.kron(jnp.eye(num_rnn, dtype=jnp.float32),
                    jnp.ones((hidden_size, hidden_size), jnp.float32))
    w_hh_masked = w_hh * mask
    # TODO(synk): show_weights() (matplotlib PDF dump of the mask) has no kernel equivalent; skipped.

    x = jax.random.uniform(k_x, (batch, T, input_size), jnp.float32)

    fwd = jax.jit(msm_layer_forward, static_argnames=("num_rnn",))
    hs_all, hidden = fwd(x, w_ih, w_hh_masked, b_ih, b_hh, num_rnn=num_rnn)
    jax.block_until_ready(hs_all)
    jax.block_until_ready(hidden)

    hs_ref, hid_ref = _reference_forward(x, w_ih, w_hh_masked, b_ih, b_hh, num_rnn)
    assert hs_all.shape == (batch, T, num_rnn, hidden_size)
    assert hidden.shape == (1, batch, H_total)
    assert jnp.allclose(hs_all, hs_ref, atol=1e-5, rtol=1e-5)
    assert jnp.allclose(hidden, hid_ref, atol=1e-5, rtol=1e-5)

    print("KERNEL_OK")
</pallas_src>

<mosaic_0001>
module attributes {stable_mosaic.version = 11 : i64} {
  func.func @_msm_rnn_kernel(%arg0: i32, %arg1: memref<2x8x4xf32, #tpu.memory_space<vmem>>, %arg2: memref<4x128xf32, #tpu.memory_space<vmem>>, %arg3: memref<128x128xf32, #tpu.memory_space<vmem>>, %arg4: memref<1x128xf32, #tpu.memory_space<vmem>>, %arg5: memref<2x128xf32, #tpu.memory_space<vmem>>, %arg6: memref<2x8x128xf32, #tpu.memory_space<vmem>>, %arg7: memref<2x128xf32, #tpu.memory_space<vmem>>, %arg8: memref<2x8x128xf32, #tpu.memory_space<vmem>>) attributes {dimension_semantics = [#tpu.dimension_semantics<arbitrary>], iteration_bounds = array<i64: 1>, scalar_prefetch = 0 : i64, scratch_operands = 2 : i64, tpu.core_type = #tpu.core_type<tc>, window_params = [{transform_indices = @transform_0, window_bounds = array<i64: 2, 8, 4>}, {pipeline_mode = #tpu.pipeline_mode<synchronous>, transform_indices = @transform_1, window_bounds = array<i64: 4, 128>}, {pipeline_mode = #tpu.pipeline_mode<synchronous>, transform_indices = @transform_2, window_bounds = array<i64: 128, 128>}, {pipeline_mode = #tpu.pipeline_mode<synchronous>, transform_indices = @transform_3, window_bounds = array<i64: 1, 128>}, {pipeline_mode = #tpu.pipeline_mode<synchronous>, transform_indices = @transform_4, window_bounds = array<i64: 2, 128>}, {transform_indices = @transform_5, window_bounds = array<i64: 2, 8, 128>}]} {
    %c0_i32 = arith.constant 0 : i32
    %0 = arith.cmpi eq, %arg0, %c0_i32 : i32
    %1 = arith.extui %0 : i1 to i32
    %c0_i32_0 = arith.constant 0 : i32
    %2 = arith.cmpi ne, %1, %c0_i32_0 : i32
    scf.if %2 {
      %c0_73 = arith.constant 0 : index
      %c0_74 = arith.constant 0 : index
      %87 = vector.load %arg5[%c0_73, %c0_74] : memref<2x128xf32, #tpu.memory_space<vmem>>, vector<2x128xf32>
      %c0_75 = arith.constant 0 : index
      %c0_76 = arith.constant 0 : index
      %88 = vector.load %arg7[%c0_75, %c0_76] : memref<2x128xf32, #tpu.memory_space<vmem>>, vector<2x128xf32>
      tpu.vector_store %arg7[%c0_75, %c0_76], %87 {strides = array<i32>} : memref<2x128xf32, #tpu.memory_space<vmem>>, vector<2x128xf32>,
    } else {
    }
    %c0 = arith.constant 0 : index
    %c0_1 = arith.constant 0 : index
    %c0_2 = arith.constant 0 : index
    %3 = vector.load %arg1[%c0, %c0_1, %c0_2] : memref<2x8x4xf32, #tpu.memory_space<vmem>>, vector<2x8x4xf32>
    %4 = vector.shape_cast %3 : vector<2x8x4xf32> to vector<16x4xf32>
    %c0_3 = arith.constant 0 : index
    %c0_4 = arith.constant 0 : index
    %5 = vector.load %arg2[%c0_3, %c0_4] : memref<4x128xf32, #tpu.memory_space<vmem>>, vector<4x128xf32>
    %cst = arith.constant dense<0.000000e+00> : vector<16x128xf32>
    %6 = tpu.matmul %4, %5, %cst {dimension_numbers = #tpu.dot_dimension_numbers<[1], [0], [0], [1], [0, 0, 1, 1], [], []>} : vector<16x4xf32>, vector<4x128xf32>, vector<16x128xf32> -> vector<16x128xf32>
    %c0_5 = arith.constant 0 : index
    %c0_6 = arith.constant 0 : index
    %7 = vector.load %arg4[%c0_5, %c0_6] : memref<1x128xf32, #tpu.memory_space<vmem>>, vector<1x128xf32>
    %8 = vector.broadcast %7 : vector<1x128xf32> to vector<16x128xf32>
    %9 = arith.addf %6, %8 : vector<16x128xf32>
    %10 = vector.shape_cast %9 : vector<16x128xf32> to vector<2x8x128xf32>
    %c0_7 = arith.constant 0 : index
    %c0_8 = arith.constant 0 : index
    %c0_9 = arith.constant 0 : index
    %11 = vector.load %arg8[%c0_7, %c0_8, %c0_9] : memref<2x8x128xf32, #tpu.memory_space<vmem>>, vector<2x8x128xf32>
    tpu.vector_store %arg8[%c0_7, %c0_8, %c0_9], %10 {strides = array<i32>} : memref<2x8x128xf32, #tpu.memory_space<vmem>>, vector<2x8x128xf32>,
    %c0_10 = arith.constant 0 : index
    %c0_11 = arith.constant 0 : index
    %12 = vector.load %arg3[%c0_10, %c0_11] : memref<128x128xf32, #tpu.memory_space<vmem>>, vector<128x128xf32>
    %c0_12 = arith.constant 0 : index
    %c0_13 = arith.constant 0 : index
    %13 = vector.load %arg7[%c0_12, %c0_13] : memref<2x128xf32, #tpu.memory_space<vmem>>, vector<2x128xf32>
    %c0_14 = arith.constant 0 : index
    %c0_15 = arith.constant 0 : index
    %c0_16 = arith.constant 0 : index
    %14 = vector.load %arg8[%c0_14, %c0_15, %c0_16] : memref<2x8x128xf32, #tpu.memory_space<vmem>>, vector<2x1x128xf32>
    %15 = vector.shape_cast %14 : vector<2x1x128xf32> to vector<2x128xf32>
    %cst_17 = arith.constant dense<0.000000e+00> : vector<2x128xf32>
    %16 = tpu.matmul %13, %12, %cst_17 {dimension_numbers = #tpu.dot_dimension_numbers<[1], [0], [0], [1], [0, 0, 1, 1], [], []>} : vector<2x128xf32>, vector<128x128xf32>, vector<2x128xf32> -> vector<2x128xf32>
    %17 = arith.addf %16, %15 : vector<2x128xf32>
    %cst_18 = arith.constant 0.000000e+00 : f32
    %18 = vector.broadcast %cst_18 : f32 to vector<2x128xf32>
    %19 = arith.maximumf %17, %18 : vector<2x128xf32>
    %c0_19 = arith.constant 0 : index
    %c0_20 = arith.constant 0 : index
    %c0_21 = arith.constant 0 : index
    %20 = vector.load %arg6[%c0_19, %c0_20, %c0_21] : memref<2x8x128xf32, #tpu.memory_space<vmem>>, vector<2x1x128xf32>
    %21 = vector.shape_cast %20 : vector<2x1x128xf32> to vector<2x128xf32>
    %22 = vector.shape_cast %19 : vector<2x128xf32> to vector<2x1x128xf32>
    tpu.vector_store %arg6[%c0_19, %c0_20, %c0_21], %22 {strides = array<i32>} : memref<2x8x128xf32, #tpu.memory_space<vmem>>, vector<2x1x128xf32>,
    %c0_22 = arith.constant 0 : index
    %c1 = arith.constant 1 : index
    %c0_23 = arith.constant 0 : index
    %23 = vector.load %arg8[%c0_22, %c1, %c0_23] : memref<2x8x128xf32, #tpu.memory_space<vmem>>, vector<2x1x128xf32>
    %24 = vector.shape_cast %23 : vector<2x1x128xf32> to vector<2x128xf32>
    %cst_24 = arith.constant dense<0.000000e+00> : vector<2x128xf32>
    %25 = tpu.matmul %19, %12, %cst_24 {dimension_numbers = #tpu.dot_dimension_numbers<[1], [0], [0], [1], [0, 0, 1, 1], [], []>} : vector<2x128xf32>, vector<128x128xf32>, vector<2x128xf32> -> vector<2x128xf32>
    %26 = arith.addf %25, %24 : vector<2x128xf32>
    %cst_25 = arith.constant 0.000000e+00 : f32
    %27 = vector.broadcast %cst_25 : f32 to vector<2x128xf32>
    %28 = arith.maximumf %26, %27 : vector<2x128xf32>
    %c0_26 = arith.constant 0 : index
    %c1_27 = arith.constant 1 : index
    %c0_28 = arith.constant 0 : index
    %29 = vector.load %arg6[%c0_26, %c1_27, %c0_28] : memref<2x8x128xf32, #tpu.memory_space<vmem>>, vector<2x1x128xf32>
    %30 = vector.shape_cast %29 : vector<2x1x128xf32> to vector<2x128xf32>
    %31 = vector.shape_cast %28 : vector<2x128xf32> to vector<2x1x128xf32>
    tpu.vector_store %arg6[%c0_26, %c1_27, %c0_28], %31 {strides = array<i32>} : memref<2x8x128xf32, #tpu.memory_space<vmem>>, vector<2x1x128xf32>,
    %c0_29 = arith.constant 0 : index
    %c2 = arith.constant 2 : index
    %c0_30 = arith.constant 0 : index
    %32 = vector.load %arg8[%c0_29, %c2, %c0_30] : memref<2x8x128xf32, #tpu.memory_space<vmem>>, vector<2x1x128xf32>
    %33 = vector.shape_cast %32 : vector<2x1x128xf32> to vector<2x128xf32>
    %cst_31 = arith.constant dense<0.000000e+00> : vector<2x128xf32>
    %34 = tpu.matmul %28, %12, %cst_31 {dimension_numbers = #tpu.dot_dimension_numbers<[1], [0], [0], [1], [0, 0, 1, 1], [], []>} : vector<2x128xf32>, vector<128x128xf32>, vector<2x128xf32> -> vector<2x128xf32>
    %35 = arith.addf %34, %33 : vector<2x128xf32>
    %cst_32 = arith.constant 0.000000e+00 : f32
    %36 = vector.broadcast %cst_32 : f32 to vector<2x128xf32>
    %37 = arith.maximumf %35, %36 : vector<2x128xf32>
    %c0_33 = arith.constant 0 : index
    %c2_34 = arith.constant 2 : index
    %c0_35 = arith.constant 0 : index
    %38 = vector.load %arg6[%c0_33, %c2_34, %c0_35] : memref<2x8x128xf32, #tpu.memory_space<vmem>>, vector<2x1x128xf32>
    %39 = vector.shape_cast %38 : vector<2x1x128xf32> to vector<2x128xf32>
    %40 = vector.shape_cast %37 : vector<2x128xf32> to vector<2x1x128xf32>
    tpu.vector_store %arg6[%c0_33, %c2_34, %c0_35], %40 {strides = array<i32>} : memref<2x8x128xf32, #tpu.memory_space<vmem>>, vector<2x1x128xf32>,
    %c0_36 = arith.constant 0 : index
    %c3 = arith.constant 3 : index
    %c0_37 = arith.constant 0 : index
    %41 = vector.load %arg8[%c0_36, %c3, %c0_37] : memref<2x8x128xf32, #tpu.memory_space<vmem>>, vector<2x1x128xf32>
    %42 = vector.shape_cast %41 : vector<2x1x128xf32> to vector<2x128xf32>
    %cst_38 = arith.constant dense<0.000000e+00> : vector<2x128xf32>
    %43 = tpu.matmul %37, %12, %cst_38 {dimension_numbers = #tpu.dot_dimension_numbers<[1], [0], [0], [1], [0, 0, 1, 1], [], []>} : vector<2x128xf32>, vector<128x128xf32>, vector<2x128xf32> -> vector<2x128xf32>
    %44 = arith.addf %43, %42 : vector<2x128xf32>
    %cst_39 = arith.constant 0.000000e+00 : f32
    %45 = vector.broadcast %cst_39 : f32 to vector<2x128xf32>
    %46 = arith.maximumf %44, %45 : vector<2x128xf32>
    %c0_40 = arith.constant 0 : index
    %c3_41 = arith.constant 3 : index
    %c0_42 = arith.constant 0 : index
    %47 = vector.load %arg6[%c0_40, %c3_41, %c0_42] : memref<2x8x128xf32, #tpu.memory_space<vmem>>, vector<2x1x128xf32>
    %48 = vector.shape_cast %47 : vector<2x1x128xf32> to vector<2x128xf32>
    %49 = vector.shape_cast %46 : vector<2x128xf32> to vector<2x1x128xf32>
    tpu.vector_store %arg6[%c0_40, %c3_41, %c0_42], %49 {strides = array<i32>} : memref<2x8x128xf32, #tpu.memory_space<vmem>>, vector<2x1x128xf32>,
    %c0_43 = arith.constant 0 : index
    %c4 = arith.constant 4 : index
    %c0_44 = arith.constant 0 : index
    %50 = vector.load %arg8[%c0_43, %c4, %c0_44] : memref<2x8x128xf32, #tpu.memory_space<vmem>>, vector<2x1x128xf32>
    %51 = vector.shape_cast %50 : vector<2x1x128xf32> to vector<2x128xf32>
    %cst_45 = arith.constant dense<0.000000e+00> : vector<2x128xf32>
    %52 = tpu.matmul %46, %12, %cst_45 {dimension_numbers = #tpu.dot_dimension_numbers<[1], [0], [0], [1], [0, 0, 1, 1], [], []>} : vector<2x128xf32>, vector<128x128xf32>, vector<2x128xf32> -> vector<2x128xf32>
    %53 = arith.addf %52, %51 : vector<2x128xf32>
    %cst_46 = arith.constant 0.000000e+00 : f32
    %54 = vector.broadcast %cst_46 : f32 to vector<2x128xf32>
    %55 = arith.maximumf %53, %54 : vector<2x128xf32>
    %c0_47 = arith.constant 0 : index
    %c4_48 = arith.constant 4 : index
    %c0_49 = arith.constant 0 : index
    %56 = vector.load %arg6[%c0_47, %c4_48, %c0_49] : memref<2x8x128xf32, #tpu.memory_space<vmem>>, vector<2x1x128xf32>
    %57 = vector.shape_cast %56 : vector<2x1x128xf32> to vector<2x128xf32>
    %58 = vector.shape_cast %55 : vector<2x128xf32> to vector<2x1x128xf32>
    tpu.vector_store %arg6[%c0_47, %c4_48, %c0_49], %58 {strides = array<i32>} : memref<2x8x128xf32, #tpu.memory_space<vmem>>, vector<2x1x128xf32>,
    %c0_50 = arith.constant 0 : index
    %c5 = arith.constant 5 : index
    %c0_51 = arith.constant 0 : index
    %59 = vector.load %arg8[%c0_50, %c5, %c0_51] : memref<2x8x128xf32, #tpu.memory_space<vmem>>, vector<2x1x128xf32>
    %60 = vector.shape_cast %59 : vector<2x1x128xf32> to vector<2x128xf32>
    %cst_52 = arith.constant dense<0.000000e+00> : vector<2x128xf32>
    %61 = tpu.matmul %55, %12, %cst_52 {dimension_numbers = #tpu.dot_dimension_numbers<[1], [0], [0], [1], [0, 0, 1, 1], [], []>} : vector<2x128xf32>, vector<128x128xf32>, vector<2x128xf32> -> vector<2x128xf32>
    %62 = arith.addf %61, %60 : vector<2x128xf32>
    %cst_53 = arith.constant 0.000000e+00 : f32
    %63 = vector.broadcast %cst_53 : f32 to vector<2x128xf32>
    %64 = arith.maximumf %62, %63 : vector<2x128xf32>
    %c0_54 = arith.constant 0 : index
    %c5_55 = arith.constant 5 : index
    %c0_56 = arith.constant 0 : index
    %65 = vector.load %arg6[%c0_54, %c5_55, %c0_56] : memref<2x8x128xf32, #tpu.memory_space<vmem>>, vector<2x1x128xf32>
    %66 = vector.shape_cast %65 : vector<2x1x128xf32> to vector<2x128xf32>
    %67 = vector.shape_cast %64 : vector<2x128xf32> to vector<2x1x128xf32>
    tpu.vector_store %arg6[%c0_54, %c5_55, %c0_56], %67 {strides = array<i32>} : memref<2x8x128xf32, #tpu.memory_space<vmem>>, vector<2x1x128xf32>,
    %c0_57 = arith.constant 0 : index
    %c6 = arith.constant 6 : index
    %c0_58 = arith.constant 0 : index
    %68 = vector.load %arg8[%c0_57, %c6, %c0_58] : memref<2x8x128xf32, #tpu.memory_space<vmem>>, vector<2x1x128xf32>
    %69 = vector.shape_cast %68 : vector<2x1x128xf32> to vector<2x128xf32>
    %cst_59 = arith.constant dense<0.000000e+00> : vector<2x128xf32>
    %70 = tpu.matmul %64, %12, %cst_59 {dimension_numbers = #tpu.dot_dimension_numbers<[1], [0], [0], [1], [0, 0, 1, 1], [], []>} : vector<2x128xf32>, vector<128x128xf32>, vector<2x128xf32> -> vector<2x128xf32>
    %71 = arith.addf %70, %69 : vector<2x128xf32>
    %cst_60 = arith.constant 0.000000e+00 : f32
    %72 = vector.broadcast %cst_60 : f32 to vector<2x128xf32>
    %73 = arith.maximumf %71, %72 : vector<2x128xf32>
    %c0_61 = arith.constant 0 : index
    %c6_62 = arith.constant 6 : index
    %c0_63 = arith.constant 0 : index
    %74 = vector.load %arg6[%c0_61, %c6_62, %c0_63] : memref<2x8x128xf32, #tpu.memory_space<vmem>>, vector<2x1x128xf32>
    %75 = vector.shape_cast %74 : vector<2x1x128xf32> to vector<2x128xf32>
    %76 = vector.shape_cast %73 : vector<2x128xf32> to vector<2x1x128xf32>
    tpu.vector_store %arg6[%c0_61, %c6_62, %c0_63], %76 {strides = array<i32>} : memref<2x8x128xf32, #tpu.memory_space<vmem>>, vector<2x1x128xf32>,
    %c0_64 = arith.constant 0 : index
    %c7 = arith.constant 7 : index
    %c0_65 = arith.constant 0 : index
    %77 = vector.load %arg8[%c0_64, %c7, %c0_65] : memref<2x8x128xf32, #tpu.memory_space<vmem>>, vector<2x1x128xf32>
    %78 = vector.shape_cast %77 : vector<2x1x128xf32> to vector<2x128xf32>
    %cst_66 = arith.constant dense<0.000000e+00> : vector<2x128xf32>
    %79 = tpu.matmul %73, %12, %cst_66 {dimension_numbers = #tpu.dot_dimension_numbers<[1], [0], [0], [1], [0, 0, 1, 1], [], []>} : vector<2x128xf32>, vector<128x128xf32>, vector<2x128xf32> -> vector<2x128xf32>
    %80 = arith.addf %79, %78 : vector<2x128xf32>
    %cst_67 = arith.constant 0.000000e+00 : f32
    %81 = vector.broadcast %cst_67 : f32 to vector<2x128xf32>
    %82 = arith.maximumf %80, %81 : vector<2x128xf32>
    %c0_68 = arith.constant 0 : index
    %c7_69 = arith.constant 7 : index
    %c0_70 = arith.constant 0 : index
    %83 = vector.load %arg6[%c0_68, %c7_69, %c0_70] : memref<2x8x128xf32, #tpu.memory_space<vmem>>, vector<2x1x128xf32>
    %84 = vector.shape_cast %83 : vector<2x1x128xf32> to vector<2x128xf32>
    %85 = vector.shape_cast %82 : vector<2x128xf32> to vector<2x1x128xf32>
    tpu.vector_store %arg6[%c0_68, %c7_69, %c0_70], %85 {strides = array<i32>} : memref<2x8x128xf32, #tpu.memory_space<vmem>>, vector<2x1x128xf32>,
    %c0_71 = arith.constant 0 : index
    %c0_72 = arith.constant 0 : index
    %86 = vector.load %arg7[%c0_71, %c0_72] : memref<2x128xf32, #tpu.memory_space<vmem>>, vector<2x128xf32>
    tpu.vector_store %arg7[%c0_71, %c0_72], %82 {strides = array<i32>} : memref<2x128xf32, #tpu.memory_space<vmem>>, vector<2x128xf32>,
    return
  }
  func.func @transform_0(%arg0: i32) -> (i32, i32, i32) {
    %c0_i32 = arith.constant 0 : i32
    %c0_i32_0 = arith.constant 0 : i32
    %c0_i32_1 = arith.constant 0 : i32
    return %c0_i32, %arg0, %c0_i32_0 : i32, i32, i32
  }
  func.func @transform_1(%arg0: i32) -> (i32, i32) {
    %c0_i32 = arith.constant 0 : i32
    %c0_i32_0 = arith.constant 0 : i32
    %c0_i32_1 = arith.constant 0 : i32
    return %c0_i32, %c0_i32_0 : i32, i32
  }
  func.func @transform_2(%arg0: i32) -> (i32, i32) {
    %c0_i32 = arith.constant 0 : i32
    %c0_i32_0 = arith.constant 0 : i32
    %c0_i32_1 = arith.constant 0 : i32
    return %c0_i32, %c0_i32_0 : i32, i32
  }
  func.func @transform_3(%arg0: i32) -> (i32, i32) {
    %c0_i32 = arith.constant 0 : i32
    %c0_i32_0 = arith.constant 0 : i32
    %c0_i32_1 = arith.constant 0 : i32
    return %c0_i32, %c0_i32_0 : i32, i32
  }
  func.func @transform_4(%arg0: i32) -> (i32, i32) {
    %c0_i32 = arith.constant 0 : i32
    %c0_i32_0 = arith.constant 0 : i32
    %c0_i32_1 = arith.constant 0 : i32
    return %c0_i32, %c0_i32_0 : i32, i32
  }
  func.func @transform_5(%arg0: i32) -> (i32, i32, i32) {
    %c0_i32 = arith.constant 0 : i32
    %c0_i32_0 = arith.constant 0 : i32
    %c0_i32_1 = arith.constant 0 : i32
    return %c0_i32, %arg0, %c0_i32_0 : i32, i32, i32
  }
}

</mosaic_0001>

<bundles_post_ra>
// kernel: msm_layer_forward.1
= control target key start
LH: loop header
LB: loop body
LE: loop exit
PB: predicated region body
PF: predicated region fallthrough
CT: control target
= control target key end

     0   :  { %vm40_vm0 = vcmask 1043456   ;;  %vm33_vm1 = vcmask 31744   ;;  %vm91_vm2 = vcmask 1041409   ;;  %s671_s1 = inlined_call_operand.vmem [shape: f32[4,128], index: 1, kind: input, shape index: {}]   ;;  %s672_s2 = inlined_call_operand.vmem [shape: f32[128,128], index: 2, kind: input, shape index: {}]   ;;  %s673_s0 = inlined_call_operand.vmem [shape: f32[2,8,4], index: 0, kind: input, shape index: {}]   ;;  %s674_s4 = inlined_call_operand.vmem [shape: f32[2,128], index: 4, kind: input, shape index: {}]   ;;  %s675_s3 = inlined_call_operand.vmem [shape: f32[1,128], index: 3, kind: input, shape index: {}]   ;;  %s676_s5 = inlined_call_operand.vmem [shape: f32[2,8,128], index: 5, kind: output, shape index: {}]  }
   0x1   :  { %v28_v0 = vld [vmem:[%s671_s1] sm:$0xf]  ;;  %v396_v1 = vld [vmem:[%s672_s2 + $0x78] sm:$0xff]  ;;  %v405_v3 = vld [vmem:[%s672_s2 + $0x70] sm:$0xff] }
   0x2   :  { %v26_v2 = vld [vmem:[%s673_s0] sm:$0xff]  ;;  %356 = vmatpush.msk.msra.mxu0 %vm40_vm0, %v28_v0  ;;  %94 = vmatpush.msra.mxu1 %v396_v1  ;;  %v411_v4 = vld [vmem:[%s672_s2 + $0x68] sm:$0xff]  ;;  %v428_v6 = vld [vmem:[%s672_s2 + $0x58] sm:$0xff] }
   0x3   :  { %357 = vmatmul.msk.f32.vlgmr.msra.gmra.mxu0 %vm33_vm1, %v26_v2  ;;  %127 = vmatpush.msra.mxu2 %v396_v1  ;;  %v419_v5 = vld [vmem:[%s672_s2 + $0x60] sm:$0xff]  ;;  %v27_v8 = vld [vmem:[%s673_s0 + $0x8] sm:$0xff]  ;;  %v443_v9 = vld [vmem:[%s672_s2 + $0x50] sm:$0xff] }
   0x4   :  { %95 = vmatpush.msra.mxu1 %v405_v3  ;;  %160 = vmatpush.msra.mxu3 %v396_v1  ;;  %v24_v7 = vld [vmem:[%s674_s4] sm:$0x3]  ;;  %v453_v10 = vld [vmem:[%s672_s2 + $0x48] sm:$0xff]  ;;  %v470_v12 = vld [vmem:[%s672_s2 + $0x38] sm:$0xff] }
   0x5   :  { %128 = vmatpush.msra.mxu2 %v405_v3  ;;  %193 = vmatpush.msrb.mxu0 %v396_v1  ;;  %25 = vst [vmem:[#allocation2] sm:$0x3] %v24_v7  ;;  %v461_v11 = vld [vmem:[%s672_s2 + $0x40] sm:$0xff]  ;;  %v479_v13 = vld [vmem:[%s672_s2 + $0x30] sm:$0xff]  ;;  %v488_v14 = vld [vmem:[%s672_s2 + $0x28] sm:$0xff] }
   0x6   :  { %96 = vmatpush.msra.mxu1 %v411_v4  ;;  %161 = vmatpush.msra.mxu3 %v405_v3  ;;  %v497_v15 = vld [vmem:[%s672_s2 + $0x20] sm:$0xff]  ;;  %v506_v16 = vld [vmem:[%s672_s2 + $0x18] sm:$0xff]  ;;  %v515_v17 = vld [vmem:[%s672_s2 + $0x10] sm:$0xff] }
   0x7   :  { %129 = vmatpush.msra.mxu2 %v411_v4  ;;  %194 = vmatpush.msrb.mxu0 %v405_v3  ;;  %v524_v18 = vld [vmem:[%s672_s2 + $0x8] sm:$0xff]  ;;  %v533_v19 = vld [vmem:[%s672_s2] sm:$0xff] }
   0x8   :  { %97 = vmatpush.msra.mxu1 %v419_v5  ;;  %162 = vmatpush.msra.mxu3 %v411_v4  ;;  %v359_v21 = vld [vmem:[%s675_s3] ss:$0 sm:$0xff] }
   0x9   :  { %130 = vmatpush.msra.mxu2 %v419_v5  ;;  %195 = vmatpush.msrb.mxu0 %v411_v4 }
   0xa   :  { %98 = vmatpush.msra.mxu1 %v428_v6  ;;  %163 = vmatpush.msra.mxu3 %v419_v5 }
   0xb   :  { %358 = vmatmul.msk.f32.gmra.mxu0 %vm33_vm1, %v27_v8  ;;  %131 = vmatpush.msra.mxu2 %v428_v6 }
   0xc   :  { %99 = vmatpush.msra.mxu1 %v443_v9  ;;  %164 = vmatpush.msra.mxu3 %v428_v6  ;;  %v85_v20 = vld [vmem:[#allocation2] sm:$0x3] }
   0xd   :  { %132 = vmatpush.msra.mxu2 %v443_v9  ;;  %196 = vmatpush.msrb.mxu0 %v419_v5 }
   0xe   :  { %100 = vmatpush.msra.mxu1 %v453_v10  ;;  %165 = vmatpush.msra.mxu3 %v443_v9 }
   0xf   :  { %133 = vmatpush.msra.mxu2 %v453_v10  ;;  %197 = vmatpush.msrb.mxu0 %v428_v6 }
  0x10   :  { %101 = vmatpush.msra.mxu1 %v461_v11  ;;  %166 = vmatpush.msra.mxu3 %v453_v10 }
  0x11   :  { %134 = vmatpush.msra.mxu2 %v461_v11  ;;  %198 = vmatpush.msrb.mxu0 %v443_v9 }
  0x12   :  { %102 = vmatpush.msra.mxu1 %v470_v12  ;;  %167 = vmatpush.msra.mxu3 %v461_v11 }
  0x13   :  { %135 = vmatpush.msra.mxu2 %v470_v12  ;;  %199 = vmatpush.msrb.mxu0 %v453_v10 }
  0x14   :  { %103 = vmatpush.msra.mxu1 %v479_v13  ;;  %168 = vmatpush.msra.mxu3 %v470_v12 }
  0x15   :  { %136 = vmatpush.msra.mxu2 %v479_v13  ;;  %200 = vmatpush.msrb.mxu0 %v461_v11 }
  0x16   :  { %104 = vmatpush.msra.mxu1 %v488_v14  ;;  %169 = vmatpush.msra.mxu3 %v479_v13 }
  0x17   :  { %137 = vmatpush.msra.mxu2 %v488_v14  ;;  %201 = vmatpush.msrb.mxu0 %v470_v12 }
  0x18   :  { %105 = vmatpush.msra.mxu1 %v497_v15  ;;  %170 = vmatpush.msra.mxu3 %v488_v14 }
  0x19   :  { %138 = vmatpush.msra.mxu2 %v497_v15  ;;  %202 = vmatpush.msrb.mxu0 %v479_v13 }
  0x1a   :  { %106 = vmatpush.msra.mxu1 %v506_v16  ;;  %171 = vmatpush.msra.mxu3 %v497_v15 }
  0x1b   :  { %139 = vmatpush.msra.mxu2 %v506_v16  ;;  %203 = vmatpush.msrb.mxu0 %v488_v14 }
  0x1c   :  { %107 = vmatpush.msra.mxu1 %v515_v17  ;;  %172 = vmatpush.msra.mxu3 %v506_v16 }
  0x1d   :  { %140 = vmatpush.msra.mxu2 %v515_v17  ;;  %204 = vmatpush.msrb.mxu0 %v497_v15 }
  0x1e   :  { %108 = vmatpush.msra.mxu1 %v524_v18  ;;  %173 = vmatpush.msra.mxu3 %v515_v17 }
  0x1f   :  { %141 = vmatpush.msra.mxu2 %v524_v18  ;;  %205 = vmatpush.msrb.mxu0 %v506_v16 }
  0x20   :  { %109 = vmatpush.msra.mxu1 %v533_v19  ;;  %174 = vmatpush.msra.mxu3 %v524_v18 }
  0x21   :  { %110 = vmatmul.f32.vlgmr.msra.gmra.mxu1 %v85_v20  ;;  %142 = vmatpush.msra.mxu2 %v533_v19 }
  0x22   :  { %175 = vmatpush.msra.mxu3 %v533_v19  ;;  %206 = vmatpush.msrb.mxu0 %v515_v17 }
  0x23   :  { %226 = vmatpush.msrb.mxu1 %v396_v1  ;;  %259 = vmatpush.msrb.mxu2 %v396_v1 }
  0x24   :  { %207 = vmatpush.msrb.mxu0 %v524_v18  ;;  %292 = vmatpush.msrb.mxu3 %v396_v1 }
  0x25   :  { %227 = vmatpush.msrb.mxu1 %v405_v3  ;;  %260 = vmatpush.msrb.mxu2 %v405_v3 }
  0x26   :  { %208 = vmatpush.msrb.mxu0 %v533_v19  ;;  %293 = vmatpush.msrb.mxu3 %v405_v3 }
  0x27   :  { %228 = vmatpush.msrb.mxu1 %v411_v4  ;;  %261 = vmatpush.msrb.mxu2 %v411_v4 }
  0x28   :  { %294 = vmatpush.msrb.mxu3 %v411_v4  ;;  %325 = vmatpush.msra.mxu0 %v396_v1 }
  0x29   :  { %229 = vmatpush.msrb.mxu1 %v419_v5  ;;  %262 = vmatpush.msrb.mxu2 %v419_v5 }
  0x2a   :  { %295 = vmatpush.msrb.mxu3 %v419_v5  ;;  %326 = vmatpush.msra.mxu0 %v405_v3 }
  0x2b   :  { %230 = vmatpush.msrb.mxu1 %v428_v6  ;;  %263 = vmatpush.msrb.mxu2 %v428_v6 }
  0x2c   :  { %296 = vmatpush.msrb.mxu3 %v428_v6  ;;  %327 = vmatpush.msra.mxu0 %v411_v4 }
  0x2d   :  { %231 = vmatpush.msrb.mxu1 %v443_v9  ;;  %264 = vmatpush.msrb.mxu2 %v443_v9 }
  0x2e   :  { %297 = vmatpush.msrb.mxu3 %v443_v9  ;;  %328 = vmatpush.msra.mxu0 %v419_v5 }
  0x2f   :  { %232 = vmatpush.msrb.mxu1 %v453_v10  ;;  %265 = vmatpush.msrb.mxu2 %v453_v10 }
  0x30   :  { %298 = vmatpush.msrb.mxu3 %v453_v10  ;;  %329 = vmatpush.msra.mxu0 %v428_v6 }
  0x31   :  { %233 = vmatpush.msrb.mxu1 %v461_v11  ;;  %266 = vmatpush.msrb.mxu2 %v461_v11 }
  0x32   :  { %299 = vmatpush.msrb.mxu3 %v461_v11  ;;  %330 = vmatpush.msra.mxu0 %v443_v9 }
  0x33   :  { %234 = vmatpush.msrb.mxu1 %v470_v12  ;;  %267 = vmatpush.msrb.mxu2 %v470_v12 }
  0x34   :  { %300 = vmatpush.msrb.mxu3 %v470_v12  ;;  %331 = vmatpush.msra.mxu0 %v453_v10 }
  0x35   :  { %235 = vmatpush.msrb.mxu1 %v479_v13  ;;  %268 = vmatpush.msrb.mxu2 %v479_v13 }
  0x36   :  { %301 = vmatpush.msrb.mxu3 %v479_v13  ;;  %332 = vmatpush.msra.mxu0 %v461_v11 }
  0x37   :  { %236 = vmatpush.msrb.mxu1 %v488_v14  ;;  %269 = vmatpush.msrb.mxu2 %v488_v14 }
  0x38   :  { %302 = vmatpush.msrb.mxu3 %v488_v14  ;;  %333 = vmatpush.msra.mxu0 %v470_v12 }
  0x39   :  { %237 = vmatpush.msrb.mxu1 %v497_v15  ;;  %270 = vmatpush.msrb.mxu2 %v497_v15 }
  0x3a   :  { %303 = vmatpush.msrb.mxu3 %v497_v15  ;;  %334 = vmatpush.msra.mxu0 %v479_v13 }
  0x3b   :  { %238 = vmatpush.msrb.mxu1 %v506_v16  ;;  %271 = vmatpush.msrb.mxu2 %v506_v16 }
  0x3c   :  { %304 = vmatpush.msrb.mxu3 %v506_v16  ;;  %335 = vmatpush.msra.mxu0 %v488_v14 }
  0x3d   :  { %239 = vmatpush.msrb.mxu1 %v515_v17  ;;  %272 = vmatpush.msrb.mxu2 %v515_v17 }
  0x3e   :  { %305 = vmatpush.msrb.mxu3 %v515_v17  ;;  %336 = vmatpush.msra.mxu0 %v497_v15 }
  0x3f   :  { %240 = vmatpush.msrb.mxu1 %v524_v18  ;;  %273 = vmatpush.msrb.mxu2 %v524_v18 }
  0x40   :  { %306 = vmatpush.msrb.mxu3 %v524_v18  ;;  %337 = vmatpush.msra.mxu0 %v506_v16 }
  0x41   :  { %241 = vmatpush.msrb.mxu1 %v533_v19  ;;  %274 = vmatpush.msrb.mxu2 %v533_v19 }
  0x42   :  { %307 = vmatpush.msrb.mxu3 %v533_v19  ;;  %338 = vmatpush.msra.mxu0 %v515_v17 }
  0x44   :  { %339 = vmatpush.msra.mxu0 %v524_v18 }
  0x46   :  { %340 = vmatpush.msra.mxu0 %v533_v19 }
  0x80   :  { %v61_v22 = vpop.f32.mrf.mxu0 }
  0x81   :  { %v62_v23 = vadd.f32 %v359_v21, %v61_v22 }
  0x83   :  { %67 = vst [vmem:[#allocation3] sm:$0xff] %v62_v23 }
  0x88   :  { %v64_v24 = vpop.f32.mrf.mxu0 }
  0x89   :  { %v65_v25 = vadd.f32 %v359_v21, %v64_v24 }
  0x8a   :  { %v86_v28 = vld [vmem:[#allocation3] sm:$0x1]  ;;  %v120_v36 = vld [vmem:[#allocation3 + $0x1] sm:$0x1]  ;;  %v153_v44 = vld [vmem:[#allocation3 + $0x2] sm:$0x1] }
  0x8b   :  { %68 = vst [vmem:[#allocation3 + $0x8] sm:$0xff] %v65_v25  ;;  %v186_v52 = vld [vmem:[#allocation3 + $0x3] sm:$0x1]  ;;  %v219_v60 = vld [vmem:[#allocation3 + $0x4] sm:$0x1] }
  0x8c   :  { %v252_v4 = vld [vmem:[#allocation3 + $0x5] sm:$0x1]  ;;  %v285_v12 = vld [vmem:[#allocation3 + $0x6] sm:$0x1]  ;;  %v318_v20 = vld [vmem:[#allocation3 + $0x7] sm:$0x1] }
  0x92   :  { %v87_v26 = vld [vmem:[#allocation3 + $0x8] sm:$0x1]  ;;  %v121_v34 = vld [vmem:[#allocation3 + $0x9] sm:$0x1]  ;;  %v154_v42 = vld [vmem:[#allocation3 + $0xa] sm:$0x1] }
  0x93   :  { %v90_v27 = vrot.slane %v87_v26, 7  ;;  %v124_v35 = vrot.slane %v121_v34, 7  ;;  %v157_v43 = vrot.slane %v154_v42, 7  ;;  %v187_v50 = vld [vmem:[#allocation3 + $0xb] sm:$0x1] }
  0x94   :  { %v190_v51 = vrot.slane %v187_v50, 7  ;;  %v220_v58 = vld [vmem:[#allocation3 + $0xc] sm:$0x1]  ;;  %v253_v2 = vld [vmem:[#allocation3 + $0xd] sm:$0x1] }
  0x95   :  { %v92_v29 = vsel %vm91_vm2, %v90_v27, %v86_v28  ;;  %v125_v37 = vsel %vm91_vm2, %v124_v35, %v120_v36  ;;  %v158_v45 = vsel %vm91_vm2, %v157_v43, %v153_v44  ;;  %v223_v59 = vrot.slane %v220_v58, 7  ;;  %v286_v10 = vld [vmem:[#allocation3 + $0xe] sm:$0x1]  ;;  %v319_v18 = vld [vmem:[#allocation3 + $0xf] sm:$0x1] }
  0x96   :  { %v191_v53 = vsel %vm91_vm2, %v190_v51, %v186_v52  ;;  %v256_v3 = vrot.slane %v253_v2, 7  ;;  %v289_v11 = vrot.slane %v286_v10, 7  ;;  %v322_v19 = vrot.slane %v319_v18, 7 }
  0x97   :  { %v224_v61 = vsel %vm91_vm2, %v223_v59, %v219_v60 }
  0x98   :  { %v257_v5 = vsel %vm91_vm2, %v256_v3, %v252_v4  ;;  %v290_v13 = vsel %vm91_vm2, %v289_v11, %v285_v12  ;;  %v323_v21 = vsel %vm91_vm2, %v322_v19, %v318_v20 }
  0x9e   :  { %v111_v30 = vpop.f32.mrf.mxu1 }
  0x9f   :  { %v112_v31 = vadd.f32 %v111_v30, %v92_v29 }
  0xa1   :  { %v114_v32 = vmax.f32 %v112_v31, 0.0 }
  0xa3   :  { %v116_v33 = vrot.slane %v114_v32, 1  ;;  %118 = vst [vmem:[%s676_s5] sm:$0x1] %v114_v32  ;;  %143 = vmatmul.f32.vlgmr.msra.gmra.mxu2 %v114_v32 }
  0xa5   :  { %119 = vst [vmem:[%s676_s5 + $0x8] sm:$0x1] %v116_v33 }
 0x126   :  { %v144_v38 = vpop.f32.mrf.mxu2 }
 0x127   :  { %v145_v39 = vadd.f32 %v144_v38, %v125_v37 }
 0x129   :  { %v147_v40 = vmax.f32 %v145_v39, 0.0 }
 0x12b   :  { %v149_v41 = vrot.slane %v147_v40, 1  ;;  %151 = vst [vmem:[%s676_s5 + $0x1] sm:$0x1] %v147_v40  ;;  %176 = vmatmul.f32.vlgmr.msra.gmra.mxu3 %v147_v40 }
 0x12d   :  { %152 = vst [vmem:[%s676_s5 + $0x9] sm:$0x1] %v149_v41 }
 0x1ae   :  { %v177_v46 = vpop.f32.mrf.mxu3 }
 0x1af   :  { %v178_v47 = vadd.f32 %v177_v46, %v158_v45 }
 0x1b1   :  { %v180_v48 = vmax.f32 %v178_v47, 0.0 }
 0x1b3   :  { %v182_v49 = vrot.slane %v180_v48, 1  ;;  %184 = vst [vmem:[%s676_s5 + $0x2] sm:$0x1] %v180_v48  ;;  %209 = vmatmul.f32.vlgmr.msrb.gmra.mxu0 %v180_v48 }
 0x1b5   :  { %185 = vst [vmem:[%s676_s5 + $0xa] sm:$0x1] %v182_v49 }
 0x230   :  { %v210_v54 = vpop.f32.mrf.mxu0 }
 0x231   :  { %v211_v55 = vadd.f32 %v210_v54, %v191_v53 }
 0x233   :  { %v213_v56 = vmax.f32 %v211_v55, 0.0 }
 0x235   :  { %v215_v57 = vrot.slane %v213_v56, 1  ;;  %217 = vst [vmem:[%s676_s5 + $0x3] sm:$0x1] %v213_v56  ;;  %242 = vmatmul.f32.vlgmr.msrb.gmra.mxu1 %v213_v56 }
 0x237   :  { %218 = vst [vmem:[%s676_s5 + $0xb] sm:$0x1] %v215_v57 }
 0x2b2   :  { %v243_v62 = vpop.f32.mrf.mxu1 }
 0x2b3   :  { %v244_v63 = vadd.f32 %v243_v62, %v224_v61 }
 0x2b5   :  { %v246_v0 = vmax.f32 %v244_v63, 0.0 }
 0x2b7   :  { %v248_v1 = vrot.slane %v246_v0, 1  ;;  %250 = vst [vmem:[%s676_s5 + $0x4] sm:$0x1] %v246_v0  ;;  %275 = vmatmul.f32.vlgmr.msrb.gmra.mxu2 %v246_v0 }
 0x2b9   :  { %251 = vst [vmem:[%s676_s5 + $0xc] sm:$0x1] %v248_v1 }
 0x33a   :  { %v276_v6 = vpop.f32.mrf.mxu2 }
 0x33b   :  { %v277_v7 = vadd.f32 %v276_v6, %v257_v5 }
 0x33d   :  { %v279_v8 = vmax.f32 %v277_v7, 0.0 }
 0x33f   :  { %v281_v9 = vrot.slane %v279_v8, 1  ;;  %283 = vst [vmem:[%s676_s5 + $0x5] sm:$0x1] %v279_v8  ;;  %308 = vmatmul.f32.vlgmr.msrb.gmra.mxu3 %v279_v8 }
 0x341   :  { %284 = vst [vmem:[%s676_s5 + $0xd] sm:$0x1] %v281_v9 }
 0x3c2   :  { %v309_v14 = vpop.f32.mrf.mxu3 }
 0x3c3   :  { %v310_v15 = vadd.f32 %v309_v14, %v290_v13 }
 0x3c5   :  { %v312_v16 = vmax.f32 %v310_v15, 0.0 }
 0x3c7   :  { %v314_v17 = vrot.slane %v312_v16, 1  ;;  %316 = vst [vmem:[%s676_s5 + $0x6] sm:$0x1] %v312_v16  ;;  %341 = vmatmul.f32.vlgmr.msra.gmra.mxu0 %v312_v16 }
 0x3c9   :  { %317 = vst [vmem:[%s676_s5 + $0xe] sm:$0x1] %v314_v17 }
 0x444   :  { %v342_v22 = vpop.f32.mrf.mxu0 }
 0x445   :  { %v343_v23 = vadd.f32 %v342_v22, %v323_v21 }
 0x447   :  { %v345_v24 = vmax.f32 %v343_v23, 0.0 }
 0x449   :  { %v347_v25 = vrot.slane %v345_v24, 1  ;;  %349 = vst [vmem:[%s676_s5 + $0x7] sm:$0x1] %v345_v24 }
 0x44a   :  { %351 = vst [vmem:[#allocation2] sm:$0x3] %v345_v24 }
 0x44b   :  { %350 = vst [vmem:[%s676_s5 + $0xf] sm:$0x1] %v347_v25 }

</bundles_post_ra>
